<compile_context>
chip_gen: v7x
topology: tpu7x:2x2x1
jax: 0.10.0
libtpu: 0.0.40
codegen_flags: <defaults>
</compile_context>

<pallas_src>
import jax
import jax.numpy as jnp
from jax import lax
from jax.experimental import pallas as pl
from jax.experimental.pallas import tpu as pltpu

SIZE_PENALTY_WEIGHT = 0.1
EPS = 1e-6               # parity with the PyTorch module; unused in forward
MAX_TILE_ROWS = 4096     # (4096, 128) f32 = 2 MiB per input per grid step
LANES = 128


def _make_kernel(tile_rows, total_rows, n_true, ragged_last):
    """Builds the kernel body with all sizes / normalizers baked in statically."""
    inv_4n = 1.0 / (4.0 * n_true)
    inv_n = 1.0 / n_true
    vreg_fold = (tile_rows % 8) == 0     # can the tile fold into one (8,128) vreg?

    def kernel(pred_ref, tgt_ref, out_ref, acc_abs_ref, acc_pen_ref):
        step = pl.program_id(0)

        if vreg_fold:
            @pl.when(step == 0)
            def _init():
                acc_abs_ref[...] = jnp.zeros_like(acc_abs_ref)
                acc_pen_ref[...] = jnp.zeros_like(acc_pen_ref)

        d = pred_ref[...].astype(jnp.float32) - tgt_ref[...].astype(jnp.float32)

        if ragged_last:
            # Last tile may extend past the array: zero the garbage rows.
            valid_rows = total_rows - step * tile_rows
            row_ids = lax.broadcasted_iota(jnp.int32, (tile_rows, LANES), 0)
            d = jnp.where(row_ids < valid_rows, d, 0.0)

        # roll by +126 (== -2 mod 128) puts d[lane+2] at `lane`; at lane%4==0
        # this is (p_x2-t_x2)-(p_x1-t_x1) = pred_w - tgt_w, at lane%4==1 the
        # height analogue.  lane%4 >= 2 (incl. wrap lanes) holds garbage that
        # is masked out once, in the final reduce.
        pen = jnp.maximum(pltpu.roll(d, shift=126, axis=1) - d, 0.0)
        a = jnp.abs(d)

        if vreg_fold:
            # Whole-vreg VPU adds, no cross-lane movement until finalize.
            acc_abs_ref[...] += a.reshape(tile_rows // 8, 8, LANES).sum(axis=0)
            acc_pen_ref[...] += pen.reshape(tile_rows // 8, 8, LANES).sum(axis=0)

            @pl.when(step == pl.num_programs(0) - 1)
            def _finalize():
                lane_ids = lax.broadcasted_iota(jnp.int32, (8, LANES), 1)
                keep = (lane_ids & 3) < 2
                pen_sum = jnp.sum(jnp.where(keep, acc_pen_ref[...], 0.0))
                abs_sum = jnp.sum(acc_abs_ref[...])
                out_ref[0, 0] = (abs_sum * inv_4n
                                 + SIZE_PENALTY_WEIGHT * pen_sum * inv_n)
        else:
            # Tiny input: a single block with < 8 (or non-multiple-of-8) rows;
            # grid == 1, reduce directly, accumulators unused.
            lane_ids = lax.broadcasted_iota(jnp.int32, (tile_rows, LANES), 1)
            keep = (lane_ids & 3) < 2
            pen_sum = jnp.sum(jnp.where(keep, pen, 0.0))
            abs_sum = jnp.sum(a)
            out_ref[0, 0] = (abs_sum * inv_4n
                             + SIZE_PENALTY_WEIGHT * pen_sum * inv_n)

    return kernel


def bbox_loss(pred, target, *, max_tile_rows=MAX_TILE_ROWS):
    """pred, target: (N, 4) boxes (x1, y1, x2, y2). Returns a scalar f32 loss."""
    n, c = pred.shape
    assert c == 4, "boxes must be (N, 4) in (x1, y1, x2, y2) order"
    assert target.shape == pred.shape

    # Free, layout-preserving flatten of the contiguous (N, 4) buffers.
    flat_p = pred.reshape(-1)
    flat_t = target.reshape(-1)
    total = n * 4

    # Only when N % 32 != 0: zero-pad the <=31-box tail so the flat buffer
    # reshapes into whole 128-lane rows (zero boxes contribute 0 to both sums).
    rem = total % LANES
    if rem:
        pad = LANES - rem
        flat_p = jnp.pad(flat_p, (0, pad))
        flat_t = jnp.pad(flat_t, (0, pad))
        total += pad

    rows = total // LANES
    p2 = flat_p.reshape(rows, LANES)   # free reshape: lane-dense, 32 boxes/row
    t2 = flat_t.reshape(rows, LANES)

    max_tile_rows = max(8, (max_tile_rows // 8) * 8)
    tile_rows = rows if rows <= max_tile_rows else max_tile_rows
    grid = pl.cdiv(rows, tile_rows)
    ragged_last = grid > 1 and (rows % tile_rows) != 0

    in_spec_kwargs = {}
    if grid >= 3:
        # Triple-buffer the inputs: per-step compute is tiny relative to DMA.
        in_spec_kwargs["pipeline_mode"] = pl.Buffered(3)
    in_spec = pl.BlockSpec((tile_rows, LANES), lambda i: (i, 0), **in_spec_kwargs)

    kernel = _make_kernel(tile_rows, rows, n, ragged_last)
    itemsize = jnp.dtype(pred.dtype).itemsize

    out = pl.pallas_call(
        kernel,
        out_shape=jax.ShapeDtypeStruct((1, 1), jnp.float32),
        grid_spec=pltpu.PrefetchScalarGridSpec(
            num_scalar_prefetch=0,
            grid=(grid,),
            in_specs=[in_spec, in_spec],
            out_specs=pl.BlockSpec((1, 1), lambda i: (0, 0),
                                   memory_space=pltpu.SMEM),
            scratch_shapes=[pltpu.VMEM((8, LANES), jnp.float32),
                            pltpu.VMEM((8, LANES), jnp.float32)],
        ),
        compiler_params=pltpu.CompilerParams(
            dimension_semantics=("arbitrary",),
        ),
        cost_estimate=pl.CostEstimate(
            flops=24 * n, transcendentals=0,
            bytes_accessed=2 * n * 4 * itemsize + 4),
    )(p2, t2)

    return out[0, 0]


def bbox_loss_ref(pred, target):
    """Pure-JAX reference matching the PyTorch forward."""
    coord_loss = jnp.mean(jnp.abs(pred - target))
    pred_w = pred[:, 2] - pred[:, 0]
    pred_h = pred[:, 3] - pred[:, 1]
    tgt_w = target[:, 2] - target[:, 0]
    tgt_h = target[:, 3] - target[:, 1]
    w_pen = jnp.maximum(pred_w - tgt_w, 0.0)
    h_pen = jnp.maximum(pred_h - tgt_h, 0.0)
    size_penalty = jnp.mean(w_pen + h_pen)
    return coord_loss + SIZE_PENALTY_WEIGHT * size_penalty


def _make_boxes(key, n):
    k1, k2 = jax.random.split(key)
    xy = jax.random.uniform(k1, (n, 2), jnp.float32, 0.0, 0.5)
    wh = jax.random.uniform(k2, (n, 2), jnp.float32, 0.1, 0.5)
    return jnp.concatenate([xy, xy + wh], axis=1)


if __name__ == "__main__":
    key = jax.random.PRNGKey(0)
    kp1, kt1, kp2, kt2, kp3, kt3 = jax.random.split(key, 6)

    # 1) Tiny case: single (1, 128) block (8 boxes padded to 32), direct reduce.
    n1 = 8
    p1, t1 = _make_boxes(kp1, n1), _make_boxes(kt1, n1)
    out1 = jax.block_until_ready(bbox_loss(p1, t1))
    ref1 = jax.block_until_ready(bbox_loss_ref(p1, t1))
    assert jnp.allclose(out1, ref1, atol=1e-5, rtol=1e-5), (out1, ref1)

    # 2) Aligned case (N % 32 == 0 -> zero-copy reshape path): multi-step
    #    accumulation with triple-buffered inputs (rows=32, tile_rows=8, grid=4).
    n2 = 1024
    p2, t2 = _make_boxes(kp2, n2), _make_boxes(kt2, n2)
    out2 = jax.block_until_ready(bbox_loss(p2, t2, max_tile_rows=8))
    ref2 = jax.block_until_ready(bbox_loss_ref(p2, t2))
    assert jnp.allclose(out2, ref2, atol=1e-5, rtol=1e-5), (out2, ref2)

    # 3) Unaligned N + ragged last tile: 1000 boxes padded to 1024 (32 rows),
    #    tile_rows=24 -> grid=2 with only 8 valid rows in the last tile.
    n3 = 1000
    p3, t3 = _make_boxes(kp3, n3), _make_boxes(kt3, n3)
    out3 = jax.block_until_ready(bbox_loss(p3, t3, max_tile_rows=24))
    ref3 = jax.block_until_ready(bbox_loss_ref(p3, t3))
    assert jnp.allclose(out3, ref3, atol=1e-5, rtol=1e-5), (out3, ref3)

    print("KERNEL_OK")
</pallas_src>

<mosaic_0001>
module attributes {stable_mosaic.version = 11 : i64} {
  func.func @kernel(%arg0: i32, %arg1: memref<1x128xf32, #tpu.memory_space<vmem>>, %arg2: memref<1x128xf32, #tpu.memory_space<vmem>>, %arg3: memref<1x1xf32, #tpu.memory_space<smem>>, %arg4: memref<8x128xf32, #tpu.memory_space<vmem>>, %arg5: memref<8x128xf32, #tpu.memory_space<vmem>>) attributes {dimension_semantics = [#tpu.dimension_semantics<arbitrary>], iteration_bounds = array<i64: 1>, scalar_prefetch = 0 : i64, scratch_operands = 2 : i64, tpu.core_type = #tpu.core_type<tc>, window_params = [{transform_indices = @transform_0, window_bounds = array<i64: 1, 128>}, {transform_indices = @transform_1, window_bounds = array<i64: 1, 128>}, {transform_indices = @transform_2, window_bounds = array<i64: 1, 1>}]} {
    %c0 = arith.constant 0 : index
    %c0_0 = arith.constant 0 : index
    %0 = vector.load %arg1[%c0, %c0_0] : memref<1x128xf32, #tpu.memory_space<vmem>>, vector<1x128xf32>
    %c0_1 = arith.constant 0 : index
    %c0_2 = arith.constant 0 : index
    %1 = vector.load %arg2[%c0_1, %c0_2] : memref<1x128xf32, #tpu.memory_space<vmem>>, vector<1x128xf32>
    %2 = arith.subf %0, %1 : vector<1x128xf32>
    %c126_i32 = arith.constant 126 : i32
    %3 = tpu.dynamic_rotate %2 by %c126_i32 dim 1 : vector<1x128xf32>, i32 -> vector<1x128xf32>
    %4 = arith.subf %3, %2 : vector<1x128xf32>
    %cst = arith.constant 0.000000e+00 : f32
    %5 = vector.broadcast %cst : f32 to vector<1x128xf32>
    %6 = arith.maximumf %4, %5 : vector<1x128xf32>
    %7 = math.absf %2 : vector<1x128xf32>
    %8 = tpu.iota {dimensions = array<i32: 1>} : vector<1x128xi32>
    %c3_i32 = arith.constant 3 : i32
    %9 = vector.broadcast %c3_i32 : i32 to vector<1x128xi32>
    %10 = arith.andi %8, %9 : vector<1x128xi32>
    %c2_i32 = arith.constant 2 : i32
    %11 = vector.broadcast %c2_i32 : i32 to vector<1x128xi32>
    %12 = arith.cmpi slt, %10, %11 : vector<1x128xi32>
    %cst_3 = arith.constant 0.000000e+00 : f32
    %13 = vector.broadcast %cst_3 : f32 to vector<1x128xf32>
    %14 = arith.select %12, %6, %13 : vector<1x128xi1>, vector<1x128xf32>
    %15 = vector.shape_cast %14 : vector<1x128xf32> to vector<1x1x128xf32>
    %cst_4 = arith.constant dense<0.000000e+00> : vector<1xf32>
    %16 = vector.multi_reduction <add>, %15, %cst_4 [1, 2] : vector<1x1x128xf32> to vector<1xf32>
    %17 = vector.shape_cast %16 : vector<1xf32> to vector<1x1x1xf32>
    %18 = vector.extract %17[0, 0, 0] : f32 from vector<1x1x1xf32>
    %19 = vector.shape_cast %7 : vector<1x128xf32> to vector<1x1x128xf32>
    %cst_5 = arith.constant dense<0.000000e+00> : vector<1xf32>
    %20 = vector.multi_reduction <add>, %19, %cst_5 [1, 2] : vector<1x1x128xf32> to vector<1xf32>
    %21 = vector.shape_cast %20 : vector<1xf32> to vector<1x1x1xf32>
    %22 = vector.extract %21[0, 0, 0] : f32 from vector<1x1x1xf32>
    %cst_6 = arith.constant 3.125000e-02 : f32
    %23 = arith.mulf %22, %cst_6 : f32
    %cst_7 = arith.constant 1.000000e-01 : f32
    %24 = arith.mulf %cst_7, %18 : f32
    %cst_8 = arith.constant 1.250000e-01 : f32
    %25 = arith.mulf %24, %cst_8 : f32
    %26 = arith.addf %23, %25 : f32
    %c0_9 = arith.constant 0 : index
    %c0_10 = arith.constant 0 : index
    %27 = memref.load %arg3[%c0_9, %c0_10] : memref<1x1xf32, #tpu.memory_space<smem>>
    memref.store %26, %arg3[%c0_9, %c0_10] : memref<1x1xf32, #tpu.memory_space<smem>>
    return
  }
  func.func @transform_0(%arg0: i32) -> (i32, i32) {
    %c0_i32 = arith.constant 0 : i32
    %c0_i32_0 = arith.constant 0 : i32
    return %arg0, %c0_i32 : i32, i32
  }
  func.func @transform_1(%arg0: i32) -> (i32, i32) {
    %c0_i32 = arith.constant 0 : i32
    %c0_i32_0 = arith.constant 0 : i32
    return %arg0, %c0_i32 : i32, i32
  }
  func.func @transform_2(%arg0: i32) -> (i32, i32) {
    %c0_i32 = arith.constant 0 : i32
    %c0_i32_0 = arith.constant 0 : i32
    %c0_i32_1 = arith.constant 0 : i32
    return %c0_i32, %c0_i32_0 : i32, i32
  }
}

</mosaic_0001>

<bundles_post_ra>
// kernel: tpu_custom_call.1
= control target key start
LH: loop header
LB: loop body
LE: loop exit
PB: predicated region body
PF: predicated region fallthrough
CT: control target
= control target key end

     0   :  { %7 = vsyncpa [#allocation5], 0  ;;  %s166_s0 = inlined_call_operand.hbm [shape: f32[1,128], index: 0, kind: input, shape index: {}]   ;;  %s167_s1 = inlined_call_operand.vmem [shape: f32[1,128], index: 1, kind: input, shape index: {}]   ;;  %s168_s2 = inlined_call_operand.hbm [shape: f32[1,1], index: 2, kind: output, shape index: {}]  }
   0x1   :  { %8 = vsyncpa [#allocation6], 0  ;;  %s121_s9 = smov [#allocation4]   ;;  %s85_s13 = scalar_lea.hbm %s166_s0, 16 }
   0x2   :  { %s15_s10 = sshll.u32 %s121_s9, 4  ;;  %p86_p0 = scmp.ne.s32.totalorder %s166_s0, %s85_s13  ;;  %s16_s10 = int_to_ptr.vmem [resolvable:$true] %s15_s10 }
   0x3   :  { %p89_p1 = scmp.lt.u32.totalorder %s85_s13, %s166_s0 }
   0x5   :  { %p91_p2 = pnand %p89_p1, %p86_p0 }
   0x7   :  { %94 = shalt.err (!%p91_p2)
}
   0x8   :  { %s95_s18 = scalar_lea.vmem %s16_s10, 16  ;;  %s99_s19 = scalar_lea.vmem %s16_s10, 32 }
   0x9   :  { %p96_p3 = scmp.ne.s32.totalorder %s16_s10, %s95_s18  ;;  %p100_p4 = scmp.lt.s32.totalorder %s16_s10, %s16_s10 }
   0xa   :  { %p101_p5 = scmp.lt.s32.totalorder %s99_s19, %s95_s18 }
   0xc   :  { %p102_p6 = por %p101_p5, %p100_p4 }
   0xe   :  { %p103_p7 = pnand %p102_p6, %p96_p3 }
  0x10   :  { %106 = shalt.err (!%p103_p7)
}
  0x11   :  { %18 = dma.hbm_to_vmem [thread:$0]  %s166_s0, 16, %s16_s10, [#allocation5]  }
  0x12   :  { %117 = dma.done.wait [#allocation5], 16  }
  0x13   :  { %118 = vsyncadd [#allocation5], 4294967280  ;;  %v24_v0 = vld [vmem:[#allocation4] sm:$0x1]  ;;  %vm37_vm0 = vcmask 1040384   ;;  %s122_s24 = smov 126   ;;  %v32_v5 = vlaneseq }
  0x14   :  { %v25_v1 = vld [vmem:[%s167_s1] sm:$0x1]  ;;  %s107_s3 = scalar_lea.hbm %s168_s2, 16 }
  0x15   :  { %v26_v2 = vsub.f32 %v24_v0, %v25_v1  ;;  %v33_v6 = vand.u32 127, %v32_v5  ;;  %p108_p8 = scmp.ne.s32.totalorder %s168_s2, %s107_s3  ;;  %p111_p9 = scmp.lt.u32.totalorder %s107_s3, %s168_s2 }
  0x17   :  { %27 = vrot.lane.b32.xlu0 %v26_v2, %s122_s24  ;;  %v31_v3 = vand.u32 2147483647, %v26_v2  ;;  %v34_v7 = vand.u32 3, %v33_v6  ;;  %p113_p10 = pnand %p111_p9, %p108_p8 }
  0x19   :  { %v48_v4 = vsel %vm37_vm0, %v31_v3, 0.0  ;;  %vm35_vm1 = vcmp.lt.s32.totalorder %v34_v7, 2 }
  0x1a   :  { %49 = vadd.xlane.f32.xlu1 %v48_v4 }
  0x89   :  { %v28_v8 = vpop.permute.xlu0 %27 }
  0x8a   :  { %v29_v9 = vsub.f32 %v28_v8, %v26_v2 }
  0x8c   :  { %v30_v10 = vmax.f32 %v29_v9, 0.0 }
  0x8e   :  { %v36_v11 = vsel %vm35_vm1, %v30_v10, 0.0 }
  0x8f   :  { %v38_v12 = vsel %vm37_vm0, %v36_v11, 0.0 }
  0x90   :  { %39 = vadd.xlane.f32.xlu0 %v38_v12 }
  0xa7   :  { %v50_v13 = vpop.xlane.xlu1 %49 }
  0xa8   :  { %v51_v14 = vrot.slane %v50_v13, 4 }
  0xaa   :  { %v52_v15 = vadd.f32 %v51_v14, %v50_v13 }
  0xac   :  { %v53_v16 = vrot.slane %v52_v15, 2 }
  0xae   :  { %v54_v20 = vadd.f32 %v53_v16, %v52_v15 }
  0xb0   :  { %v55_v23 = vrot.slane %v54_v20, 1 }
  0xb2   :  { %v56_v26 = vadd.f32 %v55_v23, %v54_v20 }
 0x11d   :  { %v40_v17 = vpop.xlane.xlu0 %39 }
 0x11e   :  { %v41_v18 = vrot.slane %v40_v17, 4 }
 0x120   :  { %v42_v19 = vadd.f32 %v41_v18, %v40_v17 }
 0x122   :  { %v43_v21 = vrot.slane %v42_v19, 2 }
 0x124   :  { %v44_v22 = vadd.f32 %v43_v21, %v42_v19 }
 0x126   :  { %v45_v24 = vrot.slane %v44_v22, 1 }
 0x128   :  { %v46_v25 = vadd.f32 %v45_v24, %v44_v22 }
 0x12a   :  { %78 = vpush %v46_v25 }
 0x12b   :  { %80 = vpush %v56_v26 }
 0x15b   :  { %s79_s0 = spop %78 }
 0x15c   :  { %s59_s1 = smul.f32 0.1, %s79_s0  ;;  %s81_s25 = spop %80 }
 0x15d   :  { %s58_s26 = smul.f32 0.03125, %s81_s25 }
 0x15e   :  { %s60_s27 = smul.f32 0.125, %s59_s1 }
 0x160   :  { %s61_s28 = sadd.f32 %s60_s27, %s58_s26 }
 0x162   :  { %63 = sst [smem:[#allocation7]] %s61_s28 }
 0x163   :  { %116 = shalt.err (!%p113_p10)
}
 0x164   :  { %s123_s8 = smov [#allocation7]  }
 0x165   :  { %71 = dma.smem_to_hbm %s123_s8, 16, %s168_s2, [#allocation6]  }
 0x166   :  { %119 = dma.done.wait [#allocation6], 16  }
 0x167   :  { %120 = vsyncadd [#allocation6], 4294967280 }
 0x168   :  { %75 = sfence }
 0x169   :  { %76 = vsyncpa [#allocation5], 1 }
 0x16a   :  { %77 = vsyncpa [#allocation6], 1 }

</bundles_post_ra>
